<compile_context>
chip_gen: v7x
topology: tpu7x:2x2x1
jax: 0.10.0
libtpu: 0.0.40
codegen_flags: <defaults>
</compile_context>

<pallas_src>
import jax
import jax.numpy as jnp
from jax.experimental import pallas as pl
from jax.experimental.pallas import tpu as pltpu


LANE = 128      # vreg lane width (last-dim tile)
SUBLANE = 8     # f32 sublane tile (second-to-last dim)


def _round_up(x, m):
    return (x + m - 1) // m * m


# ----------------------------------------------------------------------------
# Fused Pallas kernel: the whole BaseModel.forward step.
#   combined prior+posterior MLP:
#       h   = relu(x @ W1 + b1)          W1 = [Wp1 | Wq1]           (1 dot)
#       out = h @ W2 + b2                W2 = blockdiag(Wp2, Wq2)   (1 dot)
#       columns of `out`: [p_mean | p_log_std | q_mean | q_log_std]
#   sample            : state = q_mean + exp(q_log_std) * eps
#   likelihoods       : all keys stacked into one (Wl1, Wl2) block pair (2 dots)
# Everything is a full (8,128)-tiled block resident in VMEM, so all loads and
# stores are unmasked and there is a single kernel launch.
# ----------------------------------------------------------------------------
def _fused_forward_kernel(
        x_ref, eps_ref,
        w1_ref, b1_ref, w2_ref, b2_ref,
        wl1_ref, bl1_ref, wl2_ref, bl2_ref,
        stats_ref, recon_ref):
    x = x_ref[...]                                              # (B_PAD, IN_PAD) bf16

    # ---- prior + posterior first layers: one MXU push ----------------------
    h = jnp.dot(x, w1_ref[...], preferred_element_type=jnp.float32) + b1_ref[...]
    h = jnp.maximum(h, 0.0).astype(jnp.bfloat16)                # (B_PAD, 2*H_PAD)

    # ---- block-diagonal second layer: one MXU push --------------------------
    out = jnp.dot(h, w2_ref[...], preferred_element_type=jnp.float32) + b2_ref[...]
    p_mean = out[:, 0 * LANE:1 * LANE]
    p_std = jnp.exp(out[:, 1 * LANE:2 * LANE])
    q_mean = out[:, 2 * LANE:3 * LANE]
    q_std = jnp.exp(out[:, 3 * LANE:4 * LANE])

    # ---- state = posterior.sample()  (reparameterized) ----------------------
    # eps is zero outside the real state lanes and q_mean's padded lanes are
    # zero (zero weight columns / zero bias), so padded state lanes are zero.
    state = q_mean + q_std * eps_ref[...]

    # packed lane-dense stats slab: [p_mean | p_std | q_mean | q_std | state]
    stats_ref[:, 0 * LANE:1 * LANE] = p_mean
    stats_ref[:, 1 * LANE:2 * LANE] = p_std
    stats_ref[:, 2 * LANE:3 * LANE] = q_mean
    stats_ref[:, 3 * LANE:4 * LANE] = q_std
    stats_ref[:, 4 * LANE:5 * LANE] = state

    # ---- all likelihood heads in one pair of stacked dots --------------------
    sl = state.astype(jnp.bfloat16)
    hl = jnp.dot(sl, wl1_ref[...], preferred_element_type=jnp.float32) + bl1_ref[...]
    hl = jnp.maximum(hl, 0.0).astype(jnp.bfloat16)
    recon_ref[...] = jnp.dot(hl, wl2_ref[...],
                             preferred_element_type=jnp.float32) + bl2_ref[...]


# ----------------------------------------------------------------------------
# Deterministic parameter construction (synthetic; no checkpoint load).
# Weights are built padded / stacked in the exact layout the kernel expects
# and stored in bf16; biases stay f32.
# ----------------------------------------------------------------------------
def make_params(key, num_states, num_actions, obs_dims, hidden=64, scale=0.05):
    obs_keys = sorted(obs_dims)
    S, A, H = num_states, num_actions, hidden
    obs_total = sum(obs_dims[k] for k in obs_keys)

    IN_PAD = _round_up(S + A + obs_total, LANE)     # [state | action | obs | 0]
    H_PAD = _round_up(H, LANE)
    LHID_PAD = _round_up(len(obs_keys) * H, LANE)   # stacked likelihood hidden
    REC_PAD = _round_up(obs_total, LANE)            # stacked reconstructions

    keys = jax.random.split(key, 6 + 2 * len(obs_keys))
    kit = iter(range(len(keys)))

    def nrm(shape):
        return jax.random.normal(keys[next(kit)], shape, jnp.float32) * scale

    # Layer 1, column-stacked: [prior | posterior]
    #   prior depends only on (state, action) -> its obs rows stay zero.
    w1 = jnp.zeros((IN_PAD, 2 * H_PAD), jnp.float32)
    w1 = w1.at[:S + A, :H].set(nrm((S + A, H)))                                # prior
    w1 = w1.at[:S + A + obs_total, H_PAD:H_PAD + H].set(
        nrm((S + A + obs_total, H)))                                           # posterior

    # Layer 2, block-diagonal: prior hidden -> [p_mean | p_log_std] heads,
    # posterior hidden -> [q_mean | q_log_std] heads.
    w2 = jnp.zeros((2 * H_PAD, 4 * LANE), jnp.float32)
    w2 = w2.at[:H, 0 * LANE:0 * LANE + S].set(nrm((H, S)))                     # prior mean
    w2 = w2.at[:H, 1 * LANE:1 * LANE + S].set(nrm((H, S)))                     # prior log_std
    w2 = w2.at[H_PAD:H_PAD + H, 2 * LANE:2 * LANE + S].set(nrm((H, S)))        # post mean
    w2 = w2.at[H_PAD:H_PAD + H, 3 * LANE:3 * LANE + S].set(nrm((H, S)))        # post log_std

    # Likelihood heads stacked into one block pair (block-diagonal second layer)
    wl1 = jnp.zeros((LANE, LHID_PAD), jnp.float32)
    wl2 = jnp.zeros((LHID_PAD, REC_PAD), jnp.float32)
    rec_offsets = {}
    off = 0
    for i, k in enumerate(obs_keys):
        d = obs_dims[k]
        wl1 = wl1.at[:S, i * H:(i + 1) * H].set(nrm((S, H)))
        wl2 = wl2.at[i * H:(i + 1) * H, off:off + d].set(nrm((H, d)))
        rec_offsets[k] = (off, d)
        off += d

    params = {
        "w1": w1.astype(jnp.bfloat16), "b1": jnp.zeros((1, 2 * H_PAD), jnp.float32),
        "w2": w2.astype(jnp.bfloat16), "b2": jnp.zeros((1, 4 * LANE), jnp.float32),
        "wl1": wl1.astype(jnp.bfloat16), "bl1": jnp.zeros((1, LHID_PAD), jnp.float32),
        "wl2": wl2.astype(jnp.bfloat16), "bl2": jnp.zeros((1, REC_PAD), jnp.float32),
    }
    meta = {
        "num_states": S, "num_actions": A, "hidden": H,
        "obs_keys": obs_keys, "obs_dims": dict(obs_dims),
        "in_pad": IN_PAD, "rec_pad": REC_PAD, "rec_offsets": rec_offsets,
    }
    return params, meta


# ----------------------------------------------------------------------------
# BaseModel.forward (single timestep; reset=True so the state starts at zeros
# unless an explicit `state` is passed).  One fused pallas_call.
# ----------------------------------------------------------------------------
def base_model_forward(params, meta, action, observations, rng, *,
                       state=None, reconstruct=True):
    S, A = meta["num_states"], meta["num_actions"]
    obs_keys = meta["obs_keys"]
    B = action.shape[0]
    B_PAD = _round_up(max(B, 1), SUBLANE)
    IN_PAD = meta["in_pad"]

    # Fused input slab [state | action | obs... | 0].  self._state is None
    # after reset() -> the state lanes are simply left at zero.
    st0 = jnp.zeros((B, S), jnp.float32) if state is None else state.astype(jnp.float32)
    cols = [st0, action.astype(jnp.float32)]
    cols += [observations[k].astype(jnp.float32) for k in obs_keys]
    x = jnp.concatenate(cols, axis=1)
    x = jnp.pad(x, ((0, B_PAD - B), (0, IN_PAD - x.shape[1]))).astype(jnp.bfloat16)

    # Reparameterization noise, placed in the real state lanes only.
    eps = jax.random.normal(rng, (B, S), jnp.float32)
    eps = jnp.pad(eps, ((0, B_PAD - B), (0, LANE - S)))

    vmem = pl.BlockSpec(memory_space=pltpu.MemorySpace.VMEM)
    out_shapes = (
        jax.ShapeDtypeStruct((B_PAD, 5 * LANE), jnp.float32),         # packed stats
        jax.ShapeDtypeStruct((B_PAD, meta["rec_pad"]), jnp.float32),  # reconstructions
    )
    stats, rec = pl.pallas_call(
        _fused_forward_kernel,
        out_shape=out_shapes,
        in_specs=[vmem] * 10,
        out_specs=(vmem, vmem),
    )(x, eps,
      params["w1"], params["b1"], params["w2"], params["b2"],
      params["wl1"], params["bl1"], params["wl2"], params["bl2"])

    result = {
        "prior_mean": stats[:B, 0 * LANE:0 * LANE + S],
        "prior_std": stats[:B, 1 * LANE:1 * LANE + S],
        "posterior_mean": stats[:B, 2 * LANE:2 * LANE + S],
        "posterior_std": stats[:B, 3 * LANE:3 * LANE + S],
        "state": stats[:B, 4 * LANE:4 * LANE + S],
    }
    if reconstruct:
        # Note: the fused kernel always computes the (tiny) stacked recon dots;
        # reconstruct=False only controls what is returned.
        for k in obs_keys:
            o, d = meta["rec_offsets"][k]
            result["recon_" + k] = rec[:B, o:o + d]

    # TODO(synk): multi-timestep __call__ rollout loop / recurrent hidden state
    # not exercised here (self._hidden is None for feed-forward sub-modules);
    # when added, make the timestep an 'arbitrary' grid axis with constant
    # weight index_maps so weights are DMA'd into VMEM once per rollout.
    return result


# ----------------------------------------------------------------------------
if __name__ == "__main__":
    num_states = 32
    num_actions = 4
    obs_dims = {"obs": 16}
    batch = 2

    root = jax.random.PRNGKey(0)
    k_params, k_action, k_obs, k_sample = jax.random.split(root, 4)

    params, meta = make_params(k_params, num_states, num_actions, obs_dims)

    action = jax.random.normal(k_action, (batch, num_actions), jnp.float32)
    observations = {
        "obs": jax.random.normal(k_obs, (batch, obs_dims["obs"]), jnp.float32)
    }

    @jax.jit
    def fwd(p, a, obs, rng):
        return base_model_forward(p, meta, a, obs, rng, reconstruct=True)

    out = fwd(params, action, observations, k_sample)
    out = jax.block_until_ready(out)

    # light sanity checks on shapes and values
    assert out["state"].shape == (batch, num_states)
    assert out["prior_mean"].shape == (batch, num_states)
    assert out["prior_std"].shape == (batch, num_states)
    assert out["posterior_mean"].shape == (batch, num_states)
    assert out["posterior_std"].shape == (batch, num_states)
    assert out["recon_obs"].shape == (batch, obs_dims["obs"])
    assert all(bool(jnp.all(jnp.isfinite(v))) for v in out.values())
    assert bool(jnp.all(out["prior_std"] > 0)) and bool(jnp.all(out["posterior_std"] > 0))

    print("KERNEL_OK")
</pallas_src>

<mosaic_0001>
module attributes {stable_mosaic.version = 11 : i64} {
  func.func @_fused_forward_kernel(%arg0: memref<8x128xbf16, #tpu.memory_space<vmem>>, %arg1: memref<8x128xf32, #tpu.memory_space<vmem>>, %arg2: memref<128x256xbf16, #tpu.memory_space<vmem>>, %arg3: memref<1x256xf32, #tpu.memory_space<vmem>>, %arg4: memref<256x512xbf16, #tpu.memory_space<vmem>>, %arg5: memref<1x512xf32, #tpu.memory_space<vmem>>, %arg6: memref<128x128xbf16, #tpu.memory_space<vmem>>, %arg7: memref<1x128xf32, #tpu.memory_space<vmem>>, %arg8: memref<128x128xbf16, #tpu.memory_space<vmem>>, %arg9: memref<1x128xf32, #tpu.memory_space<vmem>>, %arg10: memref<8x640xf32, #tpu.memory_space<vmem>>, %arg11: memref<8x128xf32, #tpu.memory_space<vmem>>) attributes {dimension_semantics = [], scalar_prefetch = 0 : i64, scratch_operands = 0 : i64, tpu.core_type = #tpu.core_type<tc>} {
    %c0 = arith.constant 0 : index
    %c0_0 = arith.constant 0 : index
    %0 = vector.load %arg0[%c0, %c0_0] : memref<8x128xbf16, #tpu.memory_space<vmem>>, vector<8x128xbf16>
    %c0_1 = arith.constant 0 : index
    %c0_2 = arith.constant 0 : index
    %1 = vector.load %arg2[%c0_1, %c0_2] : memref<128x256xbf16, #tpu.memory_space<vmem>>, vector<128x256xbf16>
    %cst = arith.constant dense<0.000000e+00> : vector<8x256xf32>
    %2 = tpu.matmul %0, %1, %cst {dimension_numbers = #tpu.dot_dimension_numbers<[1], [0], [0], [1], [0, 0, 1, 1], [], []>} : vector<8x128xbf16>, vector<128x256xbf16>, vector<8x256xf32> -> vector<8x256xf32>
    %c0_3 = arith.constant 0 : index
    %c0_4 = arith.constant 0 : index
    %3 = vector.load %arg3[%c0_3, %c0_4] : memref<1x256xf32, #tpu.memory_space<vmem>>, vector<1x256xf32>
    %4 = vector.broadcast %3 : vector<1x256xf32> to vector<8x256xf32>
    %5 = arith.addf %2, %4 : vector<8x256xf32>
    %cst_5 = arith.constant 0.000000e+00 : f32
    %6 = vector.broadcast %cst_5 : f32 to vector<8x256xf32>
    %7 = arith.maximumf %5, %6 : vector<8x256xf32>
    %8 = arith.truncf %7 : vector<8x256xf32> to vector<8x256xbf16>
    %c0_6 = arith.constant 0 : index
    %c0_7 = arith.constant 0 : index
    %9 = vector.load %arg4[%c0_6, %c0_7] : memref<256x512xbf16, #tpu.memory_space<vmem>>, vector<256x512xbf16>
    %cst_8 = arith.constant dense<0.000000e+00> : vector<8x512xf32>
    %10 = tpu.matmul %8, %9, %cst_8 {dimension_numbers = #tpu.dot_dimension_numbers<[1], [0], [0], [1], [0, 0, 1, 1], [], []>} : vector<8x256xbf16>, vector<256x512xbf16>, vector<8x512xf32> -> vector<8x512xf32>
    %c0_9 = arith.constant 0 : index
    %c0_10 = arith.constant 0 : index
    %11 = vector.load %arg5[%c0_9, %c0_10] : memref<1x512xf32, #tpu.memory_space<vmem>>, vector<1x512xf32>
    %12 = vector.broadcast %11 : vector<1x512xf32> to vector<8x512xf32>
    %13 = arith.addf %10, %12 : vector<8x512xf32>
    %14 = vector.extract_strided_slice %13 {offsets = [0, 0], sizes = [8, 128], strides = [1, 1]} : vector<8x512xf32> to vector<8x128xf32>
    %15 = vector.extract_strided_slice %13 {offsets = [0, 128], sizes = [8, 128], strides = [1, 1]} : vector<8x512xf32> to vector<8x128xf32>
    %16 = math.exp %15 : vector<8x128xf32>
    %17 = vector.extract_strided_slice %13 {offsets = [0, 256], sizes = [8, 128], strides = [1, 1]} : vector<8x512xf32> to vector<8x128xf32>
    %18 = vector.extract_strided_slice %13 {offsets = [0, 384], sizes = [8, 128], strides = [1, 1]} : vector<8x512xf32> to vector<8x128xf32>
    %19 = math.exp %18 : vector<8x128xf32>
    %c0_11 = arith.constant 0 : index
    %c0_12 = arith.constant 0 : index
    %20 = vector.load %arg1[%c0_11, %c0_12] : memref<8x128xf32, #tpu.memory_space<vmem>>, vector<8x128xf32>
    %21 = arith.mulf %19, %20 : vector<8x128xf32>
    %22 = arith.addf %17, %21 : vector<8x128xf32>
    %c0_13 = arith.constant 0 : index
    %c0_14 = arith.constant 0 : index
    %23 = vector.load %arg10[%c0_13, %c0_14] : memref<8x640xf32, #tpu.memory_space<vmem>>, vector<8x128xf32>
    tpu.vector_store %arg10[%c0_13, %c0_14], %14 {strides = array<i32>} : memref<8x640xf32, #tpu.memory_space<vmem>>, vector<8x128xf32>,
    %c0_15 = arith.constant 0 : index
    %c128 = arith.constant 128 : index
    %24 = vector.load %arg10[%c0_15, %c128] : memref<8x640xf32, #tpu.memory_space<vmem>>, vector<8x128xf32>
    tpu.vector_store %arg10[%c0_15, %c128], %16 {strides = array<i32>} : memref<8x640xf32, #tpu.memory_space<vmem>>, vector<8x128xf32>,
    %c0_16 = arith.constant 0 : index
    %c256 = arith.constant 256 : index
    %25 = vector.load %arg10[%c0_16, %c256] : memref<8x640xf32, #tpu.memory_space<vmem>>, vector<8x128xf32>
    tpu.vector_store %arg10[%c0_16, %c256], %17 {strides = array<i32>} : memref<8x640xf32, #tpu.memory_space<vmem>>, vector<8x128xf32>,
    %c0_17 = arith.constant 0 : index
    %c384 = arith.constant 384 : index
    %26 = vector.load %arg10[%c0_17, %c384] : memref<8x640xf32, #tpu.memory_space<vmem>>, vector<8x128xf32>
    tpu.vector_store %arg10[%c0_17, %c384], %19 {strides = array<i32>} : memref<8x640xf32, #tpu.memory_space<vmem>>, vector<8x128xf32>,
    %c0_18 = arith.constant 0 : index
    %c512 = arith.constant 512 : index
    %27 = vector.load %arg10[%c0_18, %c512] : memref<8x640xf32, #tpu.memory_space<vmem>>, vector<8x128xf32>
    tpu.vector_store %arg10[%c0_18, %c512], %22 {strides = array<i32>} : memref<8x640xf32, #tpu.memory_space<vmem>>, vector<8x128xf32>,
    %28 = arith.truncf %22 : vector<8x128xf32> to vector<8x128xbf16>
    %c0_19 = arith.constant 0 : index
    %c0_20 = arith.constant 0 : index
    %29 = vector.load %arg6[%c0_19, %c0_20] : memref<128x128xbf16, #tpu.memory_space<vmem>>, vector<128x128xbf16>
    %cst_21 = arith.constant dense<0.000000e+00> : vector<8x128xf32>
    %30 = tpu.matmul %28, %29, %cst_21 {dimension_numbers = #tpu.dot_dimension_numbers<[1], [0], [0], [1], [0, 0, 1, 1], [], []>} : vector<8x128xbf16>, vector<128x128xbf16>, vector<8x128xf32> -> vector<8x128xf32>
    %c0_22 = arith.constant 0 : index
    %c0_23 = arith.constant 0 : index
    %31 = vector.load %arg7[%c0_22, %c0_23] : memref<1x128xf32, #tpu.memory_space<vmem>>, vector<1x128xf32>
    %32 = vector.broadcast %31 : vector<1x128xf32> to vector<8x128xf32>
    %33 = arith.addf %30, %32 : vector<8x128xf32>
    %cst_24 = arith.constant 0.000000e+00 : f32
    %34 = vector.broadcast %cst_24 : f32 to vector<8x128xf32>
    %35 = arith.maximumf %33, %34 : vector<8x128xf32>
    %36 = arith.truncf %35 : vector<8x128xf32> to vector<8x128xbf16>
    %c0_25 = arith.constant 0 : index
    %c0_26 = arith.constant 0 : index
    %37 = vector.load %arg8[%c0_25, %c0_26] : memref<128x128xbf16, #tpu.memory_space<vmem>>, vector<128x128xbf16>
    %cst_27 = arith.constant dense<0.000000e+00> : vector<8x128xf32>
    %38 = tpu.matmul %36, %37, %cst_27 {dimension_numbers = #tpu.dot_dimension_numbers<[1], [0], [0], [1], [0, 0, 1, 1], [], []>} : vector<8x128xbf16>, vector<128x128xbf16>, vector<8x128xf32> -> vector<8x128xf32>
    %c0_28 = arith.constant 0 : index
    %c0_29 = arith.constant 0 : index
    %39 = vector.load %arg9[%c0_28, %c0_29] : memref<1x128xf32, #tpu.memory_space<vmem>>, vector<1x128xf32>
    %40 = vector.broadcast %39 : vector<1x128xf32> to vector<8x128xf32>
    %41 = arith.addf %38, %40 : vector<8x128xf32>
    %c0_30 = arith.constant 0 : index
    %c0_31 = arith.constant 0 : index
    %42 = vector.load %arg11[%c0_30, %c0_31] : memref<8x128xf32, #tpu.memory_space<vmem>>, vector<8x128xf32>
    tpu.vector_store %arg11[%c0_30, %c0_31], %41 {strides = array<i32>} : memref<8x128xf32, #tpu.memory_space<vmem>>, vector<8x128xf32>,
    return
  }
}

</mosaic_0001>

<bundles_post_ra>
// kernel: fwd.1
= control target key start
LH: loop header
LB: loop body
LE: loop exit
PB: predicated region body
PF: predicated region fallthrough
CT: control target
= control target key end

     0   :  { %17 = vsyncpa [#allocation3], 0  ;;  %s1547_s0 = inlined_call_operand.vmem [shape: bf16[8,128], index: 0, kind: input, shape index: {}]   ;;  %s1548_s1 = inlined_call_operand.vmem [shape: f32[8,128], index: 1, kind: input, shape index: {}]   ;;  %s1549_s2 = inlined_call_operand.hbm [shape: bf16[128,256], index: 2, kind: input, shape index: {}]   ;;  %s1550_s3 = inlined_call_operand.vmem [shape: f32[1,256], index: 3, kind: input, shape index: {}]   ;;  %s1551_s4 = inlined_call_operand.hbm [shape: bf16[256,512], index: 4, kind: input, shape index: {}]   ;;  %s1552_s5 = inlined_call_operand.vmem [shape: f32[1,512], index: 5, kind: input, shape index: {}]   ;;  %s1553_s6 = inlined_call_operand.vmem [shape: bf16[128,128], index: 6, kind: input, shape index: {}]   ;;  %s1554_s7 = inlined_call_operand.vmem [shape: f32[1,128], index: 7, kind: input, shape index: {}]   ;;  %s1555_s8 = inlined_call_operand.hbm [shape: bf16[128,128], index: 8, kind: input, shape index: {}]   ;;  %s1556_s9 = inlined_call_operand.vmem [shape: f32[1,128], index: 9, kind: input, shape index: {}]   ;;  %s1557_s10 = inlined_call_operand.vmem [shape: f32[8,640], index: 10, kind: output, shape index: {0}]   ;;  %s1558_s11 = inlined_call_operand.vmem [shape: f32[8,128], index: 11, kind: output, shape index: {1}]  }
   0x1   :  { %18 = vsyncpa [#allocation5], 0  ;;  %s1347_s17 = smov [#allocation4]   ;;  %s1277_s21 = scalar_lea.hbm %s1551_s4, 8192 }
   0x2   :  { %s42_s18 = sshll.u32 %s1347_s17, 4  ;;  %p1278_p0 = scmp.ne.s32.totalorder %s1551_s4, %s1277_s21  ;;  %s43_s18 = int_to_ptr.vmem [resolvable:$true] %s42_s18 }
   0x3   :  { %p1281_p1 = scmp.lt.u32.totalorder %s1277_s21, %s1551_s4 }
   0x5   :  { %p1283_p2 = pnand %p1281_p1, %p1278_p0 }
   0x7   :  { %1286 = shalt.err (!%p1283_p2)
}
   0x8   :  { %s1287_s26 = scalar_lea.vmem %s43_s18, 8192  ;;  %p1292_p4 = scmp.lt.s32.totalorder %s43_s18, %s43_s18 }
   0x9   :  { %p1288_p3 = scmp.ne.s32.totalorder %s43_s18, %s1287_s26  ;;  %p1293_p5 = scmp.lt.s32.totalorder %s1287_s26, %s1287_s26 }
   0xb   :  { %p1294_p6 = por %p1293_p5, %p1292_p4 }
   0xd   :  { %p1295_p7 = pnand %p1294_p6, %p1288_p3 }
   0xf   :  { %1298 = shalt.err (!%p1295_p7)
}
  0x10   :  { %s1348_s27 = smov 256   ;;  %s1349_s28 = smov 16  }
  0x11   :  { %48 = dma.hbm_to_vmem [thread:$0]  %s1551_s4, 8192, %s43_s18, [#allocation5], %s1348_s27, %s1348_s27, %s1349_s28  }
  0x12   :  { %s1350_s12 = smov [#allocation2]   ;;  %s1299_s16 = scalar_lea.hbm %s1549_s2, 2048 }
  0x13   :  { %s28_s13 = sshll.u32 %s1350_s12, 4  ;;  %p1300_p8 = scmp.ne.s32.totalorder %s1549_s2, %s1299_s16  ;;  %s29_s13 = int_to_ptr.vmem [resolvable:$true] %s28_s13 }
  0x14   :  { %p1303_p9 = scmp.lt.u32.totalorder %s1299_s16, %s1549_s2 }
  0x16   :  { %p1305_p10 = pnand %p1303_p9, %p1300_p8 }
  0x18   :  { %1308 = shalt.err (!%p1305_p10)
}
  0x19   :  { %s1309_s22 = scalar_lea.vmem %s29_s13, 2048  ;;  %p1314_p12 = scmp.lt.s32.totalorder %s29_s13, %s29_s13 }
  0x1a   :  { %p1310_p11 = scmp.ne.s32.totalorder %s29_s13, %s1309_s22  ;;  %p1315_p13 = scmp.lt.s32.totalorder %s1309_s22, %s1309_s22 }
  0x1c   :  { %p1316_p0 = por %p1315_p13, %p1314_p12 }
  0x1e   :  { %p1317_p1 = pnand %p1316_p0, %p1310_p11 }
  0x20   :  { %1320 = shalt.err (!%p1317_p1)
}
  0x21   :  { %s1351_s4 = smov 128   ;;  %s1352_s18 = smov 8  }
  0x22   :  { %34 = dma.hbm_to_vmem [thread:$0]  %s1549_s2, 2048, %s29_s13, [#allocation3], %s1351_s4, %s1351_s4, %s1352_s18  }
  0x23   :  { %s1353_s25 = smov [#allocation6]   ;;  %s1321_s29 = scalar_lea.hbm %s1555_s8, 1024 }
  0x24   :  { %s60_s26 = sshll.u32 %s1353_s25, 4  ;;  %p1322_p2 = scmp.ne.s32.totalorder %s1555_s8, %s1321_s29  ;;  %s61_s26 = int_to_ptr.vmem [resolvable:$true] %s60_s26 }
  0x25   :  { %p1325_p3 = scmp.lt.u32.totalorder %s1321_s29, %s1555_s8 }
  0x27   :  { %p1327_p4 = pnand %p1325_p3, %p1322_p2 }
  0x29   :  { %1330 = shalt.err (!%p1327_p4)
}
  0x2a   :  { %s1331_s16 = scalar_lea.vmem %s61_s26, 1024  ;;  %p1336_p6 = scmp.lt.s32.totalorder %s61_s26, %s61_s26 }
  0x2b   :  { %p1332_p5 = scmp.ne.s32.totalorder %s61_s26, %s1331_s16  ;;  %p1337_p7 = scmp.lt.s32.totalorder %s1331_s16, %s1331_s16 }
  0x2d   :  { %p1338_p8 = por %p1337_p7, %p1336_p6 }
  0x2f   :  { %p1339_p9 = pnand %p1338_p8, %p1332_p5 }
  0x31   :  { %1342 = shalt.err (!%p1339_p9)
}
  0x32   :  { %s1354_s2 = smov 64   ;;  %s1355_s13 = smov 4  }
  0x33   :  { %66 = dma.hbm_to_vmem [thread:$0]  %s1555_s8, 1024, %s61_s26, [#allocation5], %s1354_s2, %s1354_s2, %s1355_s13  }
  0x34   :  { %1343 = dma.done.wait [#allocation3], 2048  }
  0x35   :  { %1344 = vsyncadd [#allocation3], 4294965248 }
  0x36   :  { %1345 = dma.done.wait [#allocation5], 9216  }
  0x37   :  { %1346 = vsyncadd [#allocation5], 4294958080  ;;  %v1356_v0 = vmov 0   ;;  %v1137_v1 = vld [vmem:[#allocation2 + $0x4] ss:$8 sps:$4 sm:$0xff]   ;;  %vm1358_vm0 = vmmov 0  }
  0x38   :  { %220 = vmatprep.mubr.bf16.mxu0 %v1356_v0  ;;  %v1139_v2 = vld [vmem:[#allocation2] ss:$8 sps:$4 sm:$0xff]   ;;  %188 = vmatprep.subr.bf16.mxu0 %v1137_v1  ;;  %v1140_v3 = vld [vmem:[#allocation2 + $0x14] ss:$8 sps:$4 sm:$0xff]   ;;  %v1142_v4 = vld [vmem:[#allocation2 + $0x10] ss:$8 sps:$4 sm:$0xff]  }
  0x39   :  { %189 = vmatpush1.bf16.msra.mxu0 %v1139_v2  ;;  %v1143_v5 = vld [vmem:[#allocation2 + $0x24] ss:$8 sps:$4 sm:$0xff]   ;;  %v1145_v6 = vld [vmem:[#allocation2 + $0x20] ss:$8 sps:$4 sm:$0xff]   ;;  %v1146_v7 = vld [vmem:[#allocation2 + $0x34] ss:$8 sps:$4 sm:$0xff]  }
  0x3a   :  { %190 = vmatprep.subr.bf16.mxu0 %v1140_v3  ;;  %v1148_v8 = vld [vmem:[#allocation2 + $0x30] ss:$8 sps:$4 sm:$0xff]   ;;  %v1161_v9 = vld [vmem:[#allocation4 + $0x4] ss:$16 sps:$4 sm:$0xff]   ;;  %v1151_v13 = vld [vmem:[#allocation2 + $0x40] ss:$8 sps:$4 sm:$0xff]  }
  0x3b   :  { %v1149_v10 = vld [vmem:[#allocation2 + $0x44] ss:$8 sps:$4 sm:$0xff]   ;;  %639 = vmatprep.subr.bf16.mxu1 %v1161_v9  ;;  %v1166_v11 = vld [vmem:[#allocation4] ss:$16 sps:$4 sm:$0xff]   ;;  %v1152_v14 = vld [vmem:[#allocation2 + $0x54] ss:$8 sps:$4 sm:$0xff]  }
  0x3c   :  { %v1167_v12 = vld [vmem:[#allocation4 + $0x24] ss:$16 sps:$4 sm:$0xff]   ;;  %640 = vmatpush1.bf16.msra.mxu1 %v1166_v11  ;;  %v1172_v15 = vld [vmem:[#allocation4 + $0x20] ss:$16 sps:$4 sm:$0xff]   ;;  %v1165_v26 = vld [vmem:[#allocation4 + $0xc] ss:$16 sps:$4 sm:$0xff]  }
  0x3d   :  { %191 = vmatpush1.bf16.msra.mxu0 %v1142_v4  ;;  %641 = vmatprep.subr.bf16.mxu1 %v1167_v12  ;;  %v1173_v16 = vld [vmem:[#allocation4 + $0x44] ss:$16 sps:$4 sm:$0xff]   ;;  %v1154_v17 = vld [vmem:[#allocation2 + $0x50] ss:$8 sps:$4 sm:$0xff]   ;;  %v1157_v21 = vld [vmem:[#allocation2 + $0x60] ss:$8 sps:$4 sm:$0xff]  }
  0x3e   :  { %192 = vmatprep.subr.bf16.mxu0 %v1143_v5  ;;  %v1155_v18 = vld [vmem:[#allocation2 + $0x64] ss:$8 sps:$4 sm:$0xff]   ;;  %v1178_v19 = vld [vmem:[#allocation4 + $0x40] ss:$16 sps:$4 sm:$0xff]   ;;  %v1158_v22 = vld [vmem:[#allocation2 + $0x74] ss:$8 sps:$4 sm:$0xff]  }
  0x3f   :  { %v1179_v20 = vld [vmem:[#allocation4 + $0x64] ss:$16 sps:$4 sm:$0xff]   ;;  %v1184_v23 = vld [vmem:[#allocation4 + $0x60] ss:$16 sps:$4 sm:$0xff]   ;;  %v1163_v30 = vld [vmem:[#allocation4 + $0x8] ss:$16 sps:$4 sm:$0xff]  }
  0x40   :  { %642 = vmatpush1.bf16.msra.mxu1 %v1172_v15  ;;  %v1185_v24 = vld [vmem:[#allocation4 + $0x84] ss:$16 sps:$4 sm:$0xff]   ;;  %v1160_v25 = vld [vmem:[#allocation2 + $0x70] ss:$8 sps:$4 sm:$0xff]   ;;  %v1171_v31 = vld [vmem:[#allocation4 + $0x2c] ss:$16 sps:$4 sm:$0xff]  }
  0x41   :  { %193 = vmatpush1.bf16.msra.mxu0 %v1145_v6  ;;  %643 = vmatprep.subr.bf16.mxu1 %v1173_v16  ;;  %v1190_v27 = vld [vmem:[#allocation4 + $0x80] ss:$16 sps:$4 sm:$0xff]   ;;  %v1191_v28 = vld [vmem:[#allocation4 + $0xa4] ss:$16 sps:$4 sm:$0xff]   ;;  %v1169_v34 = vld [vmem:[#allocation4 + $0x28] ss:$16 sps:$4 sm:$0xff]  }
  0x42   :  { %194 = vmatprep.subr.bf16.mxu0 %v1146_v7  ;;  %v79_v29 = vld [vmem:[%s1547_s0] sm:$0xf]  ;;  %v1197_v33 = vld [vmem:[#allocation4 + $0xc4] ss:$16 sps:$4 sm:$0xff]   ;;  %v1177_v35 = vld [vmem:[#allocation4 + $0x4c] ss:$16 sps:$4 sm:$0xff]  }
  0x43   :  { %v1196_v32 = vld [vmem:[#allocation4 + $0xa0] ss:$16 sps:$4 sm:$0xff]   ;;  %v1203_v37 = vld [vmem:[#allocation4 + $0xe4] ss:$16 sps:$4 sm:$0xff]   ;;  %v1175_v38 = vld [vmem:[#allocation4 + $0x48] ss:$16 sps:$4 sm:$0xff]  }
  0x44   :  { %644 = vmatpush1.bf16.msra.mxu1 %v1178_v19  ;;  %v1202_v36 = vld [vmem:[#allocation4 + $0xc0] ss:$16 sps:$4 sm:$0xff]   ;;  %v1183_v39 = vld [vmem:[#allocation4 + $0x6c] ss:$16 sps:$4 sm:$0xff]   ;;  %v1209_v41 = vld [vmem:[#allocation4 + $0x104] ss:$16 sps:$4 sm:$0xff]   ;;  %v98_v19 = vlaneseq }
  0x45   :  { %195 = vmatpush1.bf16.msra.mxu0 %v1148_v8  ;;  %645 = vmatprep.subr.bf16.mxu1 %v1179_v20  ;;  %v1208_v40 = vld [vmem:[#allocation4 + $0xe0] ss:$16 sps:$4 sm:$0xff]   ;;  %v1181_v42 = vld [vmem:[#allocation4 + $0x68] ss:$16 sps:$4 sm:$0xff]   ;;  %v1189_v43 = vld [vmem:[#allocation4 + $0x8c] ss:$16 sps:$4 sm:$0xff]  }
  0x46   :  { %196 = vmatprep.subr.bf16.mxu0 %v1149_v10  ;;  %v1214_v44 = vld [vmem:[#allocation4 + $0x100] ss:$16 sps:$4 sm:$0xff]   ;;  %v1215_v45 = vld [vmem:[#allocation4 + $0x124] ss:$16 sps:$4 sm:$0xff]   ;;  %v1187_v46 = vld [vmem:[#allocation4 + $0x88] ss:$16 sps:$4 sm:$0xff]  }
  0x47   :  { %v1220_v47 = vld [vmem:[#allocation4 + $0x120] ss:$16 sps:$4 sm:$0xff]   ;;  %v1195_v48 = vld [vmem:[#allocation4 + $0xac] ss:$16 sps:$4 sm:$0xff]   ;;  %v1221_v49 = vld [vmem:[#allocation4 + $0x144] ss:$16 sps:$4 sm:$0xff]  }
  0x48   :  { %646 = vmatpush1.bf16.msra.mxu1 %v1184_v23  ;;  %v1193_v50 = vld [vmem:[#allocation4 + $0xa8] ss:$16 sps:$4 sm:$0xff]   ;;  %v1226_v51 = vld [vmem:[#allocation4 + $0x140] ss:$16 sps:$4 sm:$0xff]   ;;  %v1201_v52 = vld [vmem:[#allocation4 + $0xcc] ss:$16 sps:$4 sm:$0xff]  }
  0x49   :  { %197 = vmatpush1.bf16.msra.mxu0 %v1151_v13  ;;  %647 = vmatprep.subr.bf16.mxu1 %v1185_v24  ;;  %v1227_v53 = vld [vmem:[#allocation4 + $0x164] ss:$16 sps:$4 sm:$0xff]   ;;  %v1199_v54 = vld [vmem:[#allocation4 + $0xc8] ss:$16 sps:$4 sm:$0xff]   ;;  %v1232_v55 = vld [vmem:[#allocation4 + $0x160] ss:$16 sps:$4 sm:$0xff]  }
  0x4a   :  { %198 = vmatprep.subr.bf16.mxu0 %v1152_v14  ;;  %v1207_v56 = vld [vmem:[#allocation4 + $0xec] ss:$16 sps:$4 sm:$0xff]   ;;  %v1233_v57 = vld [vmem:[#allocation4 + $0x184] ss:$16 sps:$4 sm:$0xff]   ;;  %v1205_v58 = vld [vmem:[#allocation4 + $0xe8] ss:$16 sps:$4 sm:$0xff]  }
  0x4b   :  { %v1238_v59 = vld [vmem:[#allocation4 + $0x180] ss:$16 sps:$4 sm:$0xff]   ;;  %v1213_v60 = vld [vmem:[#allocation4 + $0x10c] ss:$16 sps:$4 sm:$0xff]   ;;  %v1239_v61 = vld [vmem:[#allocation4 + $0x1a4] ss:$16 sps:$4 sm:$0xff]  }
  0x4c   :  { %648 = vmatpush1.bf16.msra.mxu1 %v1190_v27  ;;  %v1211_v62 = vld [vmem:[#allocation4 + $0x108] ss:$16 sps:$4 sm:$0xff]   ;;  %v1244_v63 = vld [vmem:[#allocation4 + $0x1a0] ss:$16 sps:$4 sm:$0xff]   ;;  %v1219_v0 = vld [vmem:[#allocation4 + $0x12c] ss:$16 sps:$4 sm:$0xff]  }
  0x4d   :  { %199 = vmatpush1.bf16.msra.mxu0 %v1154_v17  ;;  %649 = vmatprep.subr.bf16.mxu1 %v1191_v28  ;;  %v1217_v1 = vld [vmem:[#allocation4 + $0x128] ss:$16 sps:$4 sm:$0xff]   ;;  %v1225_v2 = vld [vmem:[#allocation4 + $0x14c] ss:$16 sps:$4 sm:$0xff]   ;;  %v1245_v10 = vld [vmem:[#allocation4 + $0x1c4] ss:$16 sps:$4 sm:$0xff]  }
  0x4e   :  { %200 = vmatprep.subr.bf16.mxu0 %v1155_v18  ;;  %v1223_v3 = vld [vmem:[#allocation4 + $0x148] ss:$16 sps:$4 sm:$0xff]   ;;  %v1231_v4 = vld [vmem:[#allocation4 + $0x16c] ss:$16 sps:$4 sm:$0xff]   ;;  %v1250_v13 = vld [vmem:[#allocation4 + $0x1c0] ss:$16 sps:$4 sm:$0xff]  }
  0x4f   :  { %v1229_v5 = vld [vmem:[#allocation4 + $0x168] ss:$16 sps:$4 sm:$0xff]   ;;  %v1237_v6 = vld [vmem:[#allocation4 + $0x18c] ss:$16 sps:$4 sm:$0xff]   ;;  %v1251_v14 = vld [vmem:[#allocation4 + $0x1e4] ss:$16 sps:$4 sm:$0xff]  }
  0x50   :  { %650 = vmatpush1.bf16.msra.mxu1 %v1196_v32  ;;  %v1235_v7 = vld [vmem:[#allocation4 + $0x188] ss:$16 sps:$4 sm:$0xff]   ;;  %v1243_v8 = vld [vmem:[#allocation4 + $0x1ac] ss:$16 sps:$4 sm:$0xff]   ;;  %v1256_v17 = vld [vmem:[#allocation4 + $0x1e0] ss:$16 sps:$4 sm:$0xff]  }
  0x51   :  { %201 = vmatpush1.bf16.msra.mxu0 %v1157_v21  ;;  %651 = vmatprep.subr.bf16.mxu1 %v1197_v33  ;;  %v1241_v9 = vld [vmem:[#allocation4 + $0x1a8] ss:$16 sps:$4 sm:$0xff]   ;;  %v1249_v11 = vld [vmem:[#allocation4 + $0x1cc] ss:$16 sps:$4 sm:$0xff]   ;;  %v1357_v18 = vmov 0.0   ;;  %v1460_v20 = vshrl.u32 %v98_v19, 7 }
  0x52   :  { %202 = vmatprep.subr.bf16.mxu0 %v1158_v22  ;;  %v1247_v12 = vld [vmem:[#allocation4 + $0x1c8] ss:$16 sps:$4 sm:$0xff]   ;;  %v1255_v15 = vld [vmem:[#allocation4 + $0x1ec] ss:$16 sps:$4 sm:$0xff]   ;;  %v96_v22 = vld [vmem:[%s1550_s3] sm:$0x3] }
  0x53   :  { %v1253_v16 = vld [vmem:[#allocation4 + $0x1e8] ss:$16 sps:$4 sm:$0xff]   ;;  %v100_v21 = vsub.s32 0, %v1460_v20  ;;  %v104_v23 = vsub.s32 1, %v1460_v20 }
  0x54   :  { %652 = vmatpush1.bf16.msra.mxu1 %v1202_v36 }
  0x55   :  { %203 = vmatpush1.bf16.msra.mxu0 %v1160_v25  ;;  %653 = vmatprep.subr.bf16.mxu1 %v1203_v37  ;;  %v101_v24 = vrot.slane %v96_v22, %v100_v21  ;;  %v105_v25 = vrot.slane %v96_v22, %v104_v23  ;;  %v1258_v37 = vld [vmem:[%s1553_s6 + $0x8] sm:$0xff]  }
  0x56   :  { %680 = vmatprep.subr.bf16.mxu0 %v1165_v26 }
  0x58   :  { %221 = vmatmul.mubr.bf16.vlgmr.msra.gmra.mrb[0].mxu0 %v79_v29  ;;  %654 = vmatpush1.bf16.msra.mxu1 %v1208_v40  ;;  %v1261_v40 = vld [vmem:[%s1553_s6 + $0x20] sm:$0xff]  }
  0x59   :  { %681 = vmatpush1.bf16.msra.mxu0 %v1163_v30  ;;  %655 = vmatprep.subr.bf16.mxu1 %v1209_v41  ;;  %v1262_v41 = vld [vmem:[%s1553_s6 + $0x28] sm:$0xff]  }
  0x5a   :  { %682 = vmatprep.subr.bf16.mxu0 %v1171_v31 }
  0x5c   :  { %656 = vmatpush1.bf16.msra.mxu1 %v1214_v44  ;;  %v1265_v44 = vld [vmem:[#allocation6] sm:$0xff]  }
  0x5d   :  { %683 = vmatpush1.bf16.msra.mxu0 %v1169_v34  ;;  %657 = vmatprep.subr.bf16.mxu1 %v1215_v45  ;;  %v1266_v45 = vld [vmem:[#allocation6 + $0x8] sm:$0xff]  }
  0x5e   :  { %684 = vmatprep.subr.bf16.mxu0 %v1177_v35  ;;  %v1257_v35 = vld [vmem:[%s1553_s6] sm:$0xff]  }
  0x60   :  { %658 = vmatpush1.bf16.msra.mxu1 %v1220_v47  ;;  %v1268_v47 = vld [vmem:[#allocation6 + $0x18] sm:$0xff]  }
  0x61   :  { %685 = vmatpush1.bf16.msra.mxu0 %v1175_v38  ;;  %659 = vmatprep.subr.bf16.mxu1 %v1221_v49  ;;  %v1259_v38 = vld [vmem:[%s1553_s6 + $0x10] sm:$0xff]   ;;  %v1270_v49 = vld [vmem:[#allocation6 + $0x28] sm:$0xff]  }
  0x62   :  { %686 = vmatprep.subr.bf16.mxu0 %v1183_v39  ;;  %v1260_v39 = vld [vmem:[%s1553_s6 + $0x18] sm:$0xff]  }
  0x64   :  { %660 = vmatpush1.bf16.msra.mxu1 %v1226_v51  ;;  %v297_v51 = vld [vmem:[%s1552_s5] sm:$0xf] }
  0x65   :  { %687 = vmatpush1.bf16.msra.mxu0 %v1181_v42  ;;  %661 = vmatprep.subr.bf16.mxu1 %v1227_v53  ;;  %v1263_v42 = vld [vmem:[%s1553_s6 + $0x30] sm:$0xff]   ;;  %v302_v53 = vrot.slane %v297_v51, %v100_v21 }
  0x66   :  { %688 = vmatprep.subr.bf16.mxu0 %v1189_v43  ;;  %v1264_v43 = vld [vmem:[%s1553_s6 + $0x38] sm:$0xff]  }
  0x68   :  { %662 = vmatpush1.bf16.msra.mxu1 %v1232_v55  ;;  %v306_v55 = vrot.slane %v297_v51, %v104_v23 }
  0x69   :  { %689 = vmatpush1.bf16.msra.mxu0 %v1187_v46  ;;  %663 = vmatprep.subr.bf16.mxu1 %v1233_v57  ;;  %v1267_v46 = vld [vmem:[#allocation6 + $0x10] sm:$0xff]  }
  0x6a   :  { %690 = vmatprep.subr.bf16.mxu0 %v1195_v48  ;;  %v1269_v48 = vld [vmem:[#allocation6 + $0x20] sm:$0xff]  }
  0x6c   :  { %664 = vmatpush1.bf16.msra.mxu1 %v1238_v59 }
  0x6d   :  { %691 = vmatpush1.bf16.msra.mxu0 %v1193_v50  ;;  %665 = vmatprep.subr.bf16.mxu1 %v1239_v61  ;;  %v309_v50 = vsub.s32 2, %v1460_v20 }
  0x6e   :  { %692 = vmatprep.subr.bf16.mxu0 %v1201_v52  ;;  %v313_v52 = vsub.s32 3, %v1460_v20 }
  0x70   :  { %666 = vmatpush1.bf16.msra.mxu1 %v1244_v63 }
  0x71   :  { %693 = vmatpush1.bf16.msra.mxu0 %v1199_v54  ;;  %667 = vmatprep.subr.bf16.mxu1 %v1245_v10  ;;  %v310_v54 = vrot.slane %v297_v51, %v309_v50 }
  0x72   :  { %694 = vmatprep.subr.bf16.mxu0 %v1207_v56  ;;  %v314_v56 = vrot.slane %v297_v51, %v313_v52 }
  0x74   :  { %668 = vmatpush1.bf16.msra.mxu1 %v1250_v13  ;;  %v1271_v13 = vld [vmem:[#allocation6 + $0x30] sm:$0xff]  }
  0x75   :  { %695 = vmatpush1.bf16.msra.mxu0 %v1205_v58  ;;  %669 = vmatprep.subr.bf16.mxu1 %v1251_v14  ;;  %v1272_v14 = vld [vmem:[#allocation6 + $0x38] sm:$0xff]  }
  0x76   :  { %696 = vmatprep.subr.bf16.mxu0 %v1213_v60 }
  0x78   :  { %670 = vmatpush1.bf16.msra.mxu1 %v1256_v17 }
  0x79   :  { %697 = vmatpush1.bf16.msra.mxu0 %v1211_v62  ;;  %1085 = vmatprep.subr.bf16.mxu1 %v1357_v18 }
  0x7a   :  { %698 = vmatprep.subr.bf16.mxu0 %v1219_v0 }
  0x7d   :  { %699 = vmatpush1.bf16.msra.mxu0 %v1217_v1 }
  0x7e   :  { %700 = vmatprep.subr.bf16.mxu0 %v1225_v2 }
  0x81   :  { %701 = vmatpush1.bf16.msra.mxu0 %v1223_v3 }
  0x82   :  { %702 = vmatprep.subr.bf16.mxu0 %v1231_v4 }
  0x85   :  { %703 = vmatpush1.bf16.msra.mxu0 %v1229_v5 }
  0x86   :  { %704 = vmatprep.subr.bf16.mxu0 %v1237_v6 }
  0x89   :  { %705 = vmatpush1.bf16.msra.mxu0 %v1235_v7  ;;  %v725_v7 = vld [vmem:[%s1548_s1] sm:$0xff] }
  0x8a   :  { %706 = vmatprep.subr.bf16.mxu0 %v1243_v8 }
  0x8d   :  { %707 = vmatpush1.bf16.msra.mxu0 %v1241_v9 }
  0x8e   :  { %708 = vmatprep.subr.bf16.mxu0 %v1249_v11 }
  0x91   :  { %709 = vmatpush1.bf16.msra.mxu0 %v1247_v12 }
  0x92   :  { %710 = vmatprep.subr.bf16.mxu0 %v1255_v15  ;;  %v1049_v15 = vld [vmem:[%s1554_s7] ss:$0 sm:$0xff] }
  0x95   :  { %711 = vmatpush1.bf16.msra.mxu0 %v1253_v16 }
  0x96   :  { %1105 = vmatprep.subr.bf16.mxu0 %v1357_v18 }
 0x12b   :  { %v222_v26 = vpop.f32.mrb[0].mxu0 }
 0x12c   :  { %v223_v27 = vadd.f32 %v222_v26, %v101_v24  ;;  %v224_v28 = vpop.f32.mrb[1].mxu0  ;;  %v1058_v24 = vld [vmem:[%s1556_s9] ss:$0 sm:$0xff] }
 0x12d   :  { %v225_v29 = vadd.f32 %v224_v28, %v105_v25  ;;  %v226_v30 = vpop.f32.mrb[2].mxu0 }
 0x12e   :  { %v229_v31 = vmax.f32 %v223_v27, 0.0  ;;  %v227_v32 = vpop.f32.mrb[3].mxu0 }
 0x12f   :  { %v230_v33 = vmax.f32 %v225_v29, 0.0 }
 0x130   :  { %v231_v36 = vpack.c.bf16 %v229_v31, %v229_v31 }
 0x131   :  { %v232_v34 = vpack.c.bf16 %v230_v33, %v230_v33 }
 0x133   :  { %671 = vmatprep.mubr.bf16.mxu1 %v232_v34  ;;  %712 = vmatprep.mubr.bf16.mxu0 %v232_v34 }
 0x134   :  { %672 = vmatmul.mubr.bf16.vlgmr.msra.gmra.mrb[0].mxu1 %v231_v36  ;;  %713 = vmatmul.mubr.bf16.vlgmr.msra.gmra.mrb[4].mxu0 %v231_v36 }
 0x135   :  { %1086 = vmatpush3.bf16.msra.mxu1 %v1257_v35  ;;  %1101 = vmatprep.mubr.msk.bf16.mxu1 %vm1358_vm0, %v1357_v18 }
 0x136   :  { %1087 = vmatprep.subr.bf16.mxu1 %v1357_v18  ;;  %1121 = vmatprep.mubr.msk.bf16.mxu0 %vm1358_vm0, %v1357_v18 }
 0x137   :  { %1106 = vmatpush3.bf16.msra.mxu0 %v1265_v44 }
 0x138   :  { %1107 = vmatprep.subr.bf16.mxu0 %v1357_v18 }
 0x139   :  { %1088 = vmatpush3.bf16.msra.mxu1 %v1258_v37 }
 0x13a   :  { %1089 = vmatprep.subr.bf16.mxu1 %v1357_v18 }
 0x13b   :  { %1108 = vmatpush3.bf16.msra.mxu0 %v1266_v45 }
 0x13c   :  { %1109 = vmatprep.subr.bf16.mxu0 %v1357_v18 }
 0x13d   :  { %1090 = vmatpush3.bf16.msra.mxu1 %v1259_v38 }
 0x13e   :  { %1091 = vmatprep.subr.bf16.mxu1 %v1357_v18 }
 0x13f   :  { %1110 = vmatpush3.bf16.msra.mxu0 %v1267_v46 }
 0x140   :  { %1111 = vmatprep.subr.bf16.mxu0 %v1357_v18 }
 0x141   :  { %1092 = vmatpush3.bf16.msra.mxu1 %v1260_v39 }
 0x142   :  { %1093 = vmatprep.subr.bf16.mxu1 %v1357_v18 }
 0x143   :  { %1112 = vmatpush3.bf16.msra.mxu0 %v1268_v47 }
 0x144   :  { %1113 = vmatprep.subr.bf16.mxu0 %v1357_v18 }
 0x145   :  { %1094 = vmatpush3.bf16.msra.mxu1 %v1261_v40 }
 0x146   :  { %1095 = vmatprep.subr.bf16.mxu1 %v1357_v18 }
 0x147   :  { %1114 = vmatpush3.bf16.msra.mxu0 %v1269_v48 }
 0x148   :  { %1115 = vmatprep.subr.bf16.mxu0 %v1357_v18 }
 0x149   :  { %1096 = vmatpush3.bf16.msra.mxu1 %v1262_v41 }
 0x14a   :  { %1097 = vmatprep.subr.bf16.mxu1 %v1357_v18 }
 0x14b   :  { %1116 = vmatpush3.bf16.msra.mxu0 %v1270_v49 }
 0x14c   :  { %1117 = vmatprep.subr.bf16.mxu0 %v1357_v18 }
 0x14d   :  { %1098 = vmatpush3.bf16.msra.mxu1 %v1263_v42 }
 0x14e   :  { %1099 = vmatprep.subr.bf16.mxu1 %v1357_v18 }
 0x14f   :  { %1118 = vmatpush3.bf16.msra.mxu0 %v1271_v13 }
 0x150   :  { %1119 = vmatprep.subr.bf16.mxu0 %v1357_v18 }
 0x151   :  { %1100 = vmatpush3.bf16.msra.mxu1 %v1264_v43 }
 0x153   :  { %1120 = vmatpush3.bf16.msra.mxu0 %v1272_v14 }
 0x207   :  { %v673_v57 = vpop.f32.mrb[0].mxu1  ;;  %v714_v58 = vpop.f32.mrb[4].mxu0 }
 0x208   :  { %v674_v59 = vadd.f32 %v673_v57, %v302_v53  ;;  %v715_v60 = vadd.f32 %v714_v58, %v310_v54  ;;  %v675_v61 = vpop.f32.mrb[1].mxu1  ;;  %v716_v62 = vpop.f32.mrb[5].mxu0 }
 0x209   :  { %v676_v63 = vadd.f32 %v675_v61, %v306_v55  ;;  %v717_v0 = vadd.f32 %v716_v62, %v314_v56  ;;  %v677_v1 = vpop.f32.mrb[2].mxu1  ;;  %v718_v2 = vpop.f32.mrb[6].mxu0 }
 0x20a   :  { %728 = vst [vmem:[%s1557_s10] sm:$0xff] %v674_v59  ;;  %730 = vst [vmem:[%s1557_s10 + $0x10] sm:$0xff] %v715_v60  ;;  %v678_v3 = vpop.f32.mrb[3].mxu1  ;;  %v719_v4 = vpop.f32.mrb[7].mxu0 }
 0x20b   :  { %v721_v5 = vmul.f32 1.442695, %v676_v63  ;;  %v723_v6 = vmul.f32 1.442695, %v717_v0 }
 0x20d   :  { %1273 = vpow2.f32 %v721_v5 }
 0x20e   :  { %1275 = vpow2.f32 %v723_v6 }
 0x217   :  { %v1274_v8 = vpop.eup %1273 }
 0x218   :  { %v1276_v9 = vpop.eup %1275  ;;  %729 = vst [vmem:[%s1557_s10 + $0x8] sm:$0xff] %v1274_v8 }
 0x219   :  { %731 = vst [vmem:[%s1557_s10 + $0x18] sm:$0xff] %v1276_v9  ;;  %v726_v10 = vmul.f32 %v1276_v9, %v725_v7 }
 0x21b   :  { %v727_v11 = vadd.f32 %v726_v10, %v715_v60 }
 0x21d   :  { %732 = vst [vmem:[%s1557_s10 + $0x20] sm:$0xff] %v727_v11  ;;  %v733_v12 = vpack.c.bf16 %v727_v11, %v727_v11 }
 0x21f   :  { %1102 = vmatmul.mubr.bf16.vlgmr.msra.gmra.mrb[4].mxu1 %v733_v12 }
 0x2f2   :  { %v839_v16 = vpop.f32.mrb[4].mxu1 }
 0x2f3   :  { %v840_v17 = vadd.f32 %v1049_v15, %v839_v16  ;;  %v1103_v19 = vpop.f32.mrb[5].mxu1 }
 0x2f4   :  { %v842_v20 = vpop.f32.mrb[6].mxu1 }
 0x2f5   :  { %v845_v21 = vmax.f32 %v840_v17, 0.0  ;;  %v1104_v22 = vpop.f32.mrb[7].mxu1 }
 0x2f7   :  { %v846_v23 = vpack.c.bf16 %v845_v21, %v845_v21 }
 0x2f9   :  { %1122 = vmatmul.mubr.bf16.vlgmr.msra.gmra.mrb[8].mxu0 %v846_v23 }
 0x3cc   :  { %v952_v25 = vpop.f32.mrb[8].mxu0 }
 0x3cd   :  { %v953_v18 = vadd.f32 %v1058_v24, %v952_v25  ;;  %v1123_v26 = vpop.f32.mrb[9].mxu0 }
 0x3ce   :  { %v955_v27 = vpop.f32.mrb[10].mxu0 }
 0x3cf   :  { %958 = vst [vmem:[%s1558_s11] sm:$0xff] %v953_v18  ;;  %v1124_v28 = vpop.f32.mrb[11].mxu0 }
 0x3d0   :  { %967 = vsyncpa [#allocation3], 1 }
 0x3d1   :  { %968 = vsyncpa [#allocation5], 1 }

</bundles_post_ra>
